<compile_context>
chip_gen: v5e
topology: v5e:2x2
jax: 0.10.0
libtpu: 0.0.40
codegen_flags: <defaults>
</compile_context>

<pallas_src>
import functools
import math

import jax
import jax.numpy as jnp
from jax import lax
from jax.experimental import pallas as pl
from jax.experimental.pallas import tpu as pltpu


def causal_head_kernel(x_ref, w_ref, o_ref, *, d_out, scale, block_q):
    # x_ref block:  (1, T, d_in)          current batch element, full sequence
    # w_ref block:  (1, d_in, 3*d_out)    this head's fused [Wq | Wk | Wv] (pre-transposed)
    # o_ref block:  (1, 1, block_q, d_out)
    qi = pl.program_id(2)

    x = x_ref[0]                                   # (T, d_in)
    w = w_ref[0]                                   # (d_in, 3*d_out)
    T = x.shape[0]
    in_dt = x.dtype

    # Fused QKV projection: one MXU matmul, f32 accumulation.
    qkv = jnp.dot(x, w, preferred_element_type=jnp.float32)       # (T, 3*d_out)
    q_full = qkv[:, :d_out].astype(in_dt)                         # (T, d_out)
    k = qkv[:, d_out:2 * d_out].astype(in_dt)                     # (T, d_out)
    v = qkv[:, 2 * d_out:].astype(in_dt)                          # (T, d_out)

    # Select this step's query tile.
    if block_q == T:                       # single tile: no slice needed
        q_start = qi * block_q             # == 0
        q = q_full
    else:
        q_start = pl.multiple_of(qi * block_q, block_q)
        q = lax.dynamic_slice_in_dim(q_full, q_start, block_q, axis=0)   # (tq, d_out)

    # Scores: contract feature dims directly (no k.T relayout), f32 accumulate.
    s = lax.dot_general(q, k, (((1,), (1,)), ((), ())),
                        preferred_element_type=jnp.float32)        # (tq, T)

    # Causal mask for this q tile (global row index = q_start + local row).
    row = lax.broadcasted_iota(jnp.int32, (block_q, T), 0) + q_start
    col = lax.broadcasted_iota(jnp.int32, (block_q, T), 1)
    s = jnp.where(col <= row, s * scale, -jnp.inf)

    # Numerically-stable softmax; reciprocal goes to the EUP slot.
    m = jnp.max(s, axis=-1, keepdims=True)
    e = jnp.exp(s - m)
    denom = jnp.sum(e, axis=-1, keepdims=True)
    p = e * pl.reciprocal(denom, approx=True)

    # TODO(synk): attention-weight dropout is identity here (dropout=0.0 / eval mode).

    ctx = jnp.dot(p.astype(in_dt), v, preferred_element_type=jnp.float32)  # (tq, d_out)
    o_ref[0, 0] = ctx.astype(o_ref.dtype)


def multi_head_attention_wrapper(x, wq, wk, wv, *, block_q=128):
    """x: (B, T, d_in).  wq/wk/wv: (num_heads, d_out, d_in) in PyTorch Linear layout.

    Returns (B, T, num_heads * d_out), i.e. torch.cat([head(x) for head in heads], -1).
    """
    B, T, d_in = x.shape
    H, d_out, _ = wq.shape
    scale = 1.0 / math.sqrt(d_out)

    # Pre-transpose + fuse QKV once, outside the kernel (pure layout plumbing in XLA):
    # (H, d_out, d_in) -> (H, d_in, 3*d_out) with columns [Wq^T | Wk^T | Wv^T].
    w_fused = jnp.concatenate(
        [jnp.swapaxes(wq, 1, 2), jnp.swapaxes(wk, 1, 2), jnp.swapaxes(wv, 1, 2)],
        axis=-1)                                                   # (H, d_in, 3*d_out)

    # q-tile size: tile T when it divides evenly, otherwise use the full sequence.
    tq = block_q if (T % block_q == 0) else T
    num_q_tiles = T // tq

    kernel = functools.partial(causal_head_kernel, d_out=d_out, scale=scale, block_q=tq)

    out = pl.pallas_call(
        kernel,
        out_shape=jax.ShapeDtypeStruct((B, H, T, d_out), x.dtype),
        grid_spec=pltpu.PrefetchScalarGridSpec(
            num_scalar_prefetch=0,
            grid=(B, H, num_q_tiles),
            in_specs=[
                pl.BlockSpec((1, T, d_in), lambda b, h, qi: (b, 0, 0)),          # x
                pl.BlockSpec((1, d_in, 3 * d_out), lambda b, h, qi: (h, 0, 0)),  # fused QKV
            ],
            out_specs=pl.BlockSpec((1, 1, tq, d_out), lambda b, h, qi: (b, h, qi, 0)),
        ),
        compiler_params=pltpu.CompilerParams(
            dimension_semantics=("parallel", "parallel", "parallel")),
    )(x, w_fused)

    # (B, H, T, d_out) -> (B, T, H*d_out): the head concat, done as cheap layout in XLA.
    return jnp.transpose(out, (0, 2, 1, 3)).reshape(B, T, H * d_out)


def reference_wrapper(x, wq, wk, wv):
    """Pure-JAX mirror of the PyTorch MultiHeadAttentionWrapper (dropout=0)."""
    B, T, _ = x.shape
    H, d_out, _ = wq.shape
    mask = jnp.triu(jnp.ones((T, T), dtype=bool), k=1)
    outs = []
    for h in range(H):
        q = x @ wq[h].T
        k = x @ wk[h].T
        v = x @ wv[h].T
        s = jnp.einsum("btd,bsd->bts", q, k)
        s = jnp.where(mask[None], -jnp.inf, s)
        p = jax.nn.softmax(s / math.sqrt(d_out), axis=-1)
        outs.append(jnp.einsum("bts,bsd->btd", p, v))
    return jnp.concatenate(outs, axis=-1)


if __name__ == "__main__":
    # Same tiny inputs as the PyTorch script: batch = stack((inputs, inputs)).
    inputs = jnp.array(
        [[0.43, 0.15, 0.89],
         [0.55, 0.87, 0.66],
         [0.57, 0.85, 0.64],
         [0.22, 0.58, 0.33],
         [0.77, 0.25, 0.10],
         [0.05, 0.80, 0.55]], dtype=jnp.float32)
    x = jnp.stack((inputs, inputs), axis=0)          # (B=2, T=6, d_in=3)

    d_in, d_out, num_heads = 3, 2, 2                 # each head projects d_in -> d_out
    context_length = x.shape[1]

    # Deterministic per-head weights, PyTorch Linear layout (d_out, d_in), no bias.
    key = jax.random.PRNGKey(0)
    kq, kk, kv = jax.random.split(key, 3)
    wq = jax.random.normal(kq, (num_heads, d_out, d_in), jnp.float32) * 0.5
    wk = jax.random.normal(kk, (num_heads, d_out, d_in), jnp.float32) * 0.5
    wv = jax.random.normal(kv, (num_heads, d_out, d_in), jnp.float32) * 0.5

    out = multi_head_attention_wrapper(x, wq, wk, wv)
    out = jax.block_until_ready(out)

    ref = reference_wrapper(x, wq, wk, wv)
    assert out.shape == (2, context_length, num_heads * d_out), out.shape
    # Tolerance accounts for pl.reciprocal(approx=True) in the softmax normalization.
    assert jnp.allclose(out, ref, atol=2e-3, rtol=2e-3), (out, ref)

    print("KERNEL_OK")
</pallas_src>

<mosaic_0001>
module attributes {stable_mosaic.version = 11 : i64} {
  func.func @causal_head_kernel(%arg0: i32, %arg1: i32, %arg2: i32, %arg3: memref<1x6x3xf32, #tpu.memory_space<vmem>>, %arg4: memref<1x3x6xf32, #tpu.memory_space<vmem>>, %arg5: memref<1x1x6x2xf32, #tpu.memory_space<vmem>>) attributes {dimension_semantics = [#tpu.dimension_semantics<parallel>, #tpu.dimension_semantics<parallel>, #tpu.dimension_semantics<parallel>], iteration_bounds = array<i64: 2, 2, 1>, scalar_prefetch = 0 : i64, scratch_operands = 0 : i64, tpu.core_type = #tpu.core_type<tc>, window_params = [{transform_indices = @transform_0, window_bounds = array<i64: 1, 6, 3>}, {transform_indices = @transform_1, window_bounds = array<i64: 1, 3, 6>}, {transform_indices = @transform_2, window_bounds = array<i64: 1, 1, 6, 2>}]} {
    %c0 = arith.constant 0 : index
    %c0_0 = arith.constant 0 : index
    %c0_1 = arith.constant 0 : index
    %0 = vector.load %arg3[%c0, %c0_0, %c0_1] : memref<1x6x3xf32, #tpu.memory_space<vmem>>, vector<1x6x3xf32>
    %1 = vector.shape_cast %0 : vector<1x6x3xf32> to vector<6x3xf32>
    %c0_2 = arith.constant 0 : index
    %c0_3 = arith.constant 0 : index
    %c0_4 = arith.constant 0 : index
    %2 = vector.load %arg4[%c0_2, %c0_3, %c0_4] : memref<1x3x6xf32, #tpu.memory_space<vmem>>, vector<1x3x6xf32>
    %3 = vector.shape_cast %2 : vector<1x3x6xf32> to vector<3x6xf32>
    %cst = arith.constant dense<0.000000e+00> : vector<6x6xf32>
    %4 = tpu.matmul %1, %3, %cst {dimension_numbers = #tpu.dot_dimension_numbers<[1], [0], [0], [1], [0, 0, 1, 1], [], []>} : vector<6x3xf32>, vector<3x6xf32>, vector<6x6xf32> -> vector<6x6xf32>
    %5 = vector.extract_strided_slice %4 {offsets = [0, 0], sizes = [6, 2], strides = [1, 1]} : vector<6x6xf32> to vector<6x2xf32>
    %6 = vector.extract_strided_slice %4 {offsets = [0, 2], sizes = [6, 2], strides = [1, 1]} : vector<6x6xf32> to vector<6x2xf32>
    %7 = vector.extract_strided_slice %4 {offsets = [0, 4], sizes = [6, 2], strides = [1, 1]} : vector<6x6xf32> to vector<6x2xf32>
    %c6_i32 = arith.constant 6 : i32
    %8 = arith.muli %arg2, %c6_i32 : i32
    %cst_5 = arith.constant dense<0.000000e+00> : vector<6x6xf32>
    %9 = tpu.matmul %5, %6, %cst_5 {dimension_numbers = #tpu.dot_dimension_numbers<[1], [1], [0], [0], [0, 0, 1, 0], [], []>} : vector<6x2xf32>, vector<6x2xf32>, vector<6x6xf32> -> vector<6x6xf32>
    %10 = tpu.iota {dimensions = array<i32: 0>} : vector<6x6xi32>
    %11 = vector.broadcast %8 : i32 to vector<6x6xi32>
    %12 = arith.addi %10, %11 : vector<6x6xi32>
    %13 = tpu.iota {dimensions = array<i32: 1>} : vector<6x6xi32>
    %14 = arith.cmpi sle, %13, %12 : vector<6x6xi32>
    %cst_6 = arith.constant 0.707106769 : f32
    %15 = vector.broadcast %cst_6 : f32 to vector<6x6xf32>
    %16 = arith.mulf %9, %15 : vector<6x6xf32>
    %cst_7 = arith.constant 0xFF800000 : f32
    %17 = vector.broadcast %cst_7 : f32 to vector<6x6xf32>
    %18 = arith.select %14, %16, %17 : vector<6x6xi1>, vector<6x6xf32>
    %cst_8 = arith.constant dense<0xFF800000> : vector<6xf32>
    %19 = vector.multi_reduction <maximumf>, %18, %cst_8 [1] : vector<6x6xf32> to vector<6xf32>
    %20 = vector.shape_cast %19 : vector<6xf32> to vector<6x1xf32>
    %21 = vector.broadcast %20 : vector<6x1xf32> to vector<6x6xf32>
    %22 = arith.subf %18, %21 : vector<6x6xf32>
    %23 = math.exp %22 : vector<6x6xf32>
    %cst_9 = arith.constant dense<0.000000e+00> : vector<6xf32>
    %24 = vector.multi_reduction <add>, %23, %cst_9 [1] : vector<6x6xf32> to vector<6xf32>
    %25 = vector.shape_cast %24 : vector<6xf32> to vector<6x1xf32>
    %26 = tpu.reciprocal %25 {approx = true} : vector<6x1xf32> -> vector<6x1xf32>
    %27 = vector.broadcast %26 : vector<6x1xf32> to vector<6x6xf32>
    %28 = arith.mulf %23, %27 : vector<6x6xf32>
    %cst_10 = arith.constant dense<0.000000e+00> : vector<6x2xf32>
    %29 = tpu.matmul %28, %7, %cst_10 {dimension_numbers = #tpu.dot_dimension_numbers<[1], [0], [0], [1], [0, 0, 1, 1], [], []>} : vector<6x6xf32>, vector<6x2xf32>, vector<6x2xf32> -> vector<6x2xf32>
    %c0_11 = arith.constant 0 : index
    %c0_12 = arith.constant 0 : index
    %c0_13 = arith.constant 0 : index
    %c0_14 = arith.constant 0 : index
    %30 = vector.load %arg5[%c0_11, %c0_12, %c0_13, %c0_14] : memref<1x1x6x2xf32, #tpu.memory_space<vmem>>, vector<1x1x6x2xf32>
    %31 = vector.shape_cast %30 : vector<1x1x6x2xf32> to vector<6x2xf32>
    %32 = vector.shape_cast %29 : vector<6x2xf32> to vector<1x1x6x2xf32>
    tpu.vector_store %arg5[%c0_11, %c0_12, %c0_13, %c0_14], %32 {strides = array<i32>} : memref<1x1x6x2xf32, #tpu.memory_space<vmem>>, vector<1x1x6x2xf32>,
    return
  }
  func.func @transform_0(%arg0: i32, %arg1: i32, %arg2: i32) -> (i32, i32, i32) {
    %c0_i32 = arith.constant 0 : i32
    %c0_i32_0 = arith.constant 0 : i32
    %c0_i32_1 = arith.constant 0 : i32
    return %arg0, %c0_i32, %c0_i32_0 : i32, i32, i32
  }
  func.func @transform_1(%arg0: i32, %arg1: i32, %arg2: i32) -> (i32, i32, i32) {
    %c0_i32 = arith.constant 0 : i32
    %c0_i32_0 = arith.constant 0 : i32
    %c0_i32_1 = arith.constant 0 : i32
    return %arg1, %c0_i32, %c0_i32_0 : i32, i32, i32
  }
  func.func @transform_2(%arg0: i32, %arg1: i32, %arg2: i32) -> (i32, i32, i32, i32) {
    %c0_i32 = arith.constant 0 : i32
    %c0_i32_0 = arith.constant 0 : i32
    return %arg0, %arg1, %arg2, %c0_i32 : i32, i32, i32, i32
  }
}

</mosaic_0001>

<bundles_post_ra>
// kernel: tpu_custom_call.1
= control target key start
LH: loop header
LB: loop body
LE: loop exit
PB: predicated region body
PF: predicated region fallthrough
CT: control target
= control target key end

     0   :  { %s529_s9 = smov 0   ;;  %s531_s10 = smov 0   ;;  %s591_s0 = inlined_call_operand.vmem [shape: f32[2,6,3], index: 0, kind: input, shape index: {}]   ;;  %s592_s1 = inlined_call_operand.vmem [shape: f32[2,3,6], index: 1, kind: input, shape index: {}]   ;;  %s593_s2 = inlined_call_operand.vmem [shape: f32[2,2,6,2], index: 2, kind: output, shape index: {}]  }
   0x1   :  { %s533_s11 = smov 0   ;;  %s535_s12 = smov 0  }
   0x2   :  { %s537_s13 = smov 0  }
   0x3 LB: > { %s27_s14 = sadd.s32 1, %s502_s11  ;;  %s31_s15 = sadd.s32 1, %s506_s12  ;;  %s510_s13 = sphi %s537_s13, %s12_s13   ;;  %s506_s12 = sphi %s535_s12, %s597_s12   ;;  %s502_s11 = sphi %s533_s11, %s596_s11   ;;  %s498_s10 = sphi %s531_s10, %s595_s10   ;;  %s494_s9 = sphi %s529_s9, %s594_s9  }
   0x4   : > { %p29_p0 = scmp.ge.s32.totalorder %s27_s14, 2  ;;  %p413_p1 = scmp.ge.s32.totalorder %s510_s13, 1 }
   0x5   : > { %p143_p2 = scmp.lt.s32.totalorder %s510_s13, 5 }
   0x6   : > { %s599_s14 = smov (%p29_p0, %s27_s14), 0  ;;  %s601_s15 = smov (!%p29_p0, %s31_s15), %s506_s12 }
   0x7   : > { %p144_p3 = pnand %p413_p1, %p143_p2  ;;  %p33_p4 = scmp.ge.s32.totalorder %s601_s15, 2 }
   0x8   : > { %p178_p5 = scmp.lt.s32.totalorder (!%p144_p3), %s494_s9, 1  ;;  %p174_p6 = scmp.lt.s32.totalorder (!%p144_p3), %s498_s10, 1 }
   0x9   : > { %s603_s15 = smov (%p33_p4, %s601_s15), 0  ;;  %147 = sbr.rel (%p144_p3) target bundleno = 795 (0x31b), region = 28 }
   0xa   : > { %s512_s24 = smov (!%p144_p3), 126   ;;  %s513_s25 = smov (!%p144_p3), 124  }
   0xe   : > { %s605_s9 = smov (!%p178_p5, %s494_s9), 1  ;;  %s607_s10 = smov (!%p174_p6, %s498_s10), 1  ;;  %vm199_vm0 = vcmask 1042432   ;;  %vm195_vm1 = vcmask 23552   ;;  %vm227_vm2 = vcmask 15360   ;;  %v252_v4 = vlaneseq }
   0xf   : > { %s415_s16 = sshll.u32 %s605_s9, 2  ;;  %s414_s20 = sshll.u32 %s607_s10, 3  ;;  %vm261_vm4 = vcmask 46080   ;;  %vm279_vm5 = vcmask 1045504   ;;  %vm275_vm6 = vcmask 48128   ;;  %vm302_vm7 = vcmask 13312  }
  0x10   : > { %s181_s19 = scalar_lea.vmem %s592_s1, %s415_s16  ;;  %s177_s23 = scalar_lea.vmem %s591_s0, %s414_s20  ;;  %v253_v5 = vshrl.u32 %v252_v4, 7  ;;  %v257_v6 = vand.u32 127, %v252_v4 }
  0x11   : > { %v194_v0 = vld [vmem:[%s181_s19] sm:$0x7]  ;;  %s416_s26 = sshll.u32 %s607_s10, 1 }
  0x12   : > { %418 = vmatpush.msk.msra.mxu0 %vm199_vm0, %v194_v0  ;;  %v193_v1 = vld [vmem:[%s177_s23] sm:$0x3f]  ;;  %vm258_vm3 = vcmp.le.s32.totalorder %v257_v6, %v253_v5  ;;  %s190_s27 = sadd.s32 %s416_s26, %s605_s9 }
  0x13   : > { %419 = vmatmul.msk.f32.vlgmr.msra.gmra.mxu0 %vm195_vm1, %v193_v1  ;;  %s417_s28 = sshll.u32 %s190_s27, 3 }
  0x14   : > { %s192_s3 = scalar_lea.vmem %s593_s2, %s417_s28 }
  0x90   : > { %v220_v2 = vpop.f32.mrf.mxu0 }
  0x91   : > { %225 = vrot.lane.b32.xlu0 %v220_v2, %s512_s24 }
 0x103   : > { %v226_v3 = vpop.permute.xlu0 %225 }
 0x104   : > { %420 = vmatpush.xpose.msk.msra.mxu1 %vm227_vm2, %v226_v3 }
 0x107   : > { %421 = vmatmul.msk.f32.vlgmr.msra.gmra.mxu1 %vm227_vm2, %v220_v2 }
 0x184   : > { %v249_v7 = vpop.f32.mrf.mxu1 }
 0x185   : > { %v259_v8 = vmul.f32 0.70710677, %v249_v7 }
 0x187   : > { %v260_v9 = vsel %vm258_vm3, %v259_v8, -inf }
 0x188   : > { %v262_v10 = vsel %vm261_vm4, %v260_v9, -inf }
 0x189   : > { %263 = vmax.xlane.f32.xlu0 %v262_v10 }
 0x1fc   : > { %v264_v11 = vpop.xlane.xlu0 %263 }
 0x1fd   : > { %v265_v12 = vsub.f32 %v260_v9, %v264_v11 }
 0x1ff   : > { %v266_v13 = vmul.f32 1.442695, %v265_v12 }
 0x201   : > { %468 = vpow2.f32 %v266_v13 }
 0x207   : > { %v469_v14 = vpop.eup %468 }
 0x208   : > { %v268_v15 = vsel %vm261_vm4, %v469_v14, 0.0 }
 0x209   : > { %269 = vadd.xlane.f32.xlu1 %v268_v15 }
 0x222   : > { %273 = vrot.lane.b32.xlu1 %v220_v2, %s513_s25 }
 0x27c   : > { %v270_v16 = vpop.xlane.xlu1 %269 }
 0x27d   : > { %470 = vrcp.f32 %v270_v16 }
 0x283   : > { %v471_v17 = vpop.eup %470 }
 0x284   : > { %v272_v19 = vmul.f32 %v471_v17, %v469_v14 }
 0x294   : > { %v274_v18 = vpop.permute.xlu1 %273 }
 0x295   : > { %422 = vmatpush.msk.msra.mxu2 %vm279_vm5, %v274_v18 }
 0x296   : > { %423 = vmatmul.msk.f32.vlgmr.msra.gmra.mxu2 %vm275_vm6, %v272_v19 }
 0x319   : > { %v299_v20 = vpop.f32.mrf.mxu2 }
 0x31a   : > { %303 = vst.msk [vmem:[%s192_s3] sm:$0x3f] %vm302_vm7, %v299_v20 }
 0x31b PF: > { %s12_s13 = sadd.s32 1, %s510_s13   ;;  %s594_s9 = smov %s502_s11 }
 0x31c   : > { %p9_p7 = scmp.ge.s32.totalorder %s12_s13, 6   ;;  %s595_s10 = smov %s506_s12 }
 0x31d   : > { %s596_s11 = smov %s599_s14  ;;  %s597_s12 = smov %s603_s15 }
 0x31e   :  { %11 = sbr.rel (!%p9_p7) target bundleno = 3 (0x3), region = 61 }

</bundles_post_ra>
